<compile_context>
chip_gen: v7x
topology: tpu7x:2x2x1
jax: 0.10.0
libtpu: 0.0.40
codegen_flags: <defaults>
</compile_context>

<pallas_src>
import math

import jax
import jax.numpy as jnp
from jax.experimental import pallas as pl
from jax.experimental.pallas import tpu as pltpu


def _linear_kernel(x_ref, w_ref, b_ref, o_ref):
    # y = b + x @ W_t : MXU matmul with f32 accumulate; bias hoisted into the
    # accumulator so the epilogue is a single VPU add.
    o_ref[...] = (
        b_ref[...]
        + jnp.dot(x_ref[...], w_ref[...], preferred_element_type=jnp.float32)
    ).astype(o_ref.dtype)


def eegnet_classifier_forward(x, w_t, b, *, batch_tile=2048):
    """Linear forward y = x @ w_t + b.

    x:   (B, K) float32   -- same layout as the PyTorch Linear input
    w_t: (K, N) float32   -- weight pre-transposed (parameter-prep time)
    b:   (N,) or (1, N) float32
    returns (B, N) float32
    """
    B, K = x.shape
    N = w_t.shape[1]
    b2 = jnp.reshape(b, (1, N))

    itemsize = jnp.dtype(x.dtype).itemsize
    cost = pl.CostEstimate(
        flops=2 * B * K * N,
        transcendentals=0,
        bytes_accessed=(B * K + K * N + N + B * N) * itemsize,
    )

    if B <= batch_tile:
        # Whole-problem-in-VMEM path: no grid, no pipeline, no double buffers,
        # exact (B, N) output (no padding, no post-kernel slice).
        return pl.pallas_call(
            _linear_kernel,
            out_shape=jax.ShapeDtypeStruct((B, N), x.dtype),
            in_specs=[
                pl.BlockSpec(memory_space=pltpu.MemorySpace.VMEM),
                pl.BlockSpec(memory_space=pltpu.MemorySpace.VMEM),
                pl.BlockSpec(memory_space=pltpu.MemorySpace.VMEM),
            ],
            out_specs=pl.BlockSpec(memory_space=pltpu.MemorySpace.VMEM),
            cost_estimate=cost,
        )(x, w_t, b2)

    # Large-batch path: tile only the batch axis; weight/bias stay resident.
    # Ragged final block handled by Pallas (OOB edge stores are masked), so
    # NO host-side jnp.pad of x and NO trailing slice of the output.
    n_blocks = pl.cdiv(B, batch_tile)
    return pl.pallas_call(
        _linear_kernel,
        out_shape=jax.ShapeDtypeStruct((B, N), x.dtype),
        grid=(n_blocks,),
        in_specs=[
            pl.BlockSpec((batch_tile, K), lambda i: (i, 0)),
            pl.BlockSpec((K, N), lambda i: (0, 0)),   # weight resident in VMEM
            pl.BlockSpec((1, N), lambda i: (0, 0)),   # bias resident in VMEM
        ],
        out_specs=pl.BlockSpec((batch_tile, N), lambda i: (i, 0)),
        compiler_params=pltpu.CompilerParams(
            dimension_semantics=("parallel",)
        ),
        cost_estimate=cost,
    )(x, w_t, b2)


if __name__ == "__main__":
    # Module hyperparameters (consistent with the PyTorch __init__):
    F2 = 8
    Samples = 128                              # Samples // (4 * 8) == 4
    n_classes = 4
    in_features = F2 * (Samples // (4 * 8))    # = 32
    batch = 2

    key = jax.random.PRNGKey(0)
    kx, kw, kb, kx2 = jax.random.split(key, 4)

    # Deterministic parameter init mimicking nn.Linear default:
    # U(-1/sqrt(in_features), 1/sqrt(in_features))
    bound = 1.0 / math.sqrt(in_features)
    weight = jax.random.uniform(
        kw, (n_classes, in_features), jnp.float32, minval=-bound, maxval=bound
    )
    bias = jax.random.uniform(
        kb, (n_classes,), jnp.float32, minval=-bound, maxval=bound
    )
    # Parameter prep done once, outside the per-call path.
    w_t = weight.T  # (in_features, n_classes)

    # Small-batch example input (batch, in_features), PyTorch-forward layout.
    x = jax.random.normal(kx, (batch, in_features), jnp.float32)
    out = eegnet_classifier_forward(x, w_t, bias)
    out = jax.block_until_ready(out)

    ref = x @ weight.T + bias
    assert out.shape == (batch, n_classes)
    assert jnp.allclose(out, ref, atol=1e-5, rtol=1e-5)

    # Also exercise the batch-tiled grid path, including a RAGGED final block
    # (600 = 2*256 + 88) to verify edge-masked partial output stores.
    big_batch = 600
    x_big = jax.random.normal(kx2, (big_batch, in_features), jnp.float32)
    out_big = eegnet_classifier_forward(x_big, w_t, bias, batch_tile=256)
    out_big = jax.block_until_ready(out_big)
    ref_big = x_big @ weight.T + bias
    assert out_big.shape == (big_batch, n_classes)
    assert jnp.allclose(out_big, ref_big, atol=1e-5, rtol=1e-5)

    print("KERNEL_OK")
</pallas_src>

<mosaic_0001>
module attributes {stable_mosaic.version = 11 : i64} {
  func.func @_linear_kernel(%arg0: memref<2x32xf32, #tpu.memory_space<vmem>>, %arg1: memref<32x4xf32, #tpu.memory_space<vmem>>, %arg2: memref<1x4xf32, #tpu.memory_space<vmem>>, %arg3: memref<2x4xf32, #tpu.memory_space<vmem>>) attributes {dimension_semantics = [], scalar_prefetch = 0 : i64, scratch_operands = 0 : i64, tpu.core_type = #tpu.core_type<tc>} {
    %c0 = arith.constant 0 : index
    %c0_0 = arith.constant 0 : index
    %0 = vector.load %arg2[%c0, %c0_0] : memref<1x4xf32, #tpu.memory_space<vmem>>, vector<1x4xf32>
    %c0_1 = arith.constant 0 : index
    %c0_2 = arith.constant 0 : index
    %1 = vector.load %arg0[%c0_1, %c0_2] : memref<2x32xf32, #tpu.memory_space<vmem>>, vector<2x32xf32>
    %c0_3 = arith.constant 0 : index
    %c0_4 = arith.constant 0 : index
    %2 = vector.load %arg1[%c0_3, %c0_4] : memref<32x4xf32, #tpu.memory_space<vmem>>, vector<32x4xf32>
    %cst = arith.constant dense<0.000000e+00> : vector<2x4xf32>
    %3 = tpu.matmul %1, %2, %cst {dimension_numbers = #tpu.dot_dimension_numbers<[1], [0], [0], [1], [0, 0, 1, 1], [], []>} : vector<2x32xf32>, vector<32x4xf32>, vector<2x4xf32> -> vector<2x4xf32>
    %4 = vector.broadcast %0 : vector<1x4xf32> to vector<2x4xf32>
    %5 = arith.addf %4, %3 : vector<2x4xf32>
    %c0_5 = arith.constant 0 : index
    %c0_6 = arith.constant 0 : index
    %6 = vector.load %arg3[%c0_5, %c0_6] : memref<2x4xf32, #tpu.memory_space<vmem>>, vector<2x4xf32>
    tpu.vector_store %arg3[%c0_5, %c0_6], %5 {strides = array<i32>} : memref<2x4xf32, #tpu.memory_space<vmem>>, vector<2x4xf32>,
    return
  }
}

</mosaic_0001>

<bundles_post_ra>
// kernel: tpu_custom_call.1
= control target key start
LH: loop header
LB: loop body
LE: loop exit
PB: predicated region body
PF: predicated region fallthrough
CT: control target
= control target key end

     0   :  { %v170_v3 = vmov 0.0|0.0   ;;  %vm171_vm0 = vmmov 0   ;;  %v172_v6 = vmov 0.0   ;;  %s224_s0 = inlined_call_operand.vmem [shape: f32[2,32], index: 0, kind: input, shape index: {}]   ;;  %s225_s1 = inlined_call_operand.vmem [shape: f32[32,4], index: 1, kind: input, shape index: {}]   ;;  %s226_s2 = inlined_call_operand.vmem [shape: f32[1,4], index: 2, kind: input, shape index: {}]   ;;  %s227_s3 = inlined_call_operand.hbm [shape: f32[2,4], index: 3, kind: output, shape index: {}]  }
   0x1   :  { %v17_v0 = vld [vmem:[%s225_s1] sm:$0xff]  ;;  %v18_v1 = vld [vmem:[%s225_s1 + $0x8] sm:$0xff]  ;;  %v19_v2 = vld [vmem:[%s225_s1 + $0x10] sm:$0xff]  ;;  %136 = vmatprep.subr.bf16.mxu0 %v170_v3  ;;  %133 = vmatprep.mubr.msk.f32.mxu0 %vm171_vm0, %v172_v6 }
   0x2   :  { %v137_v4 = vpack.c.bf16 %v18_v1, %v17_v0  ;;  %v20_v5 = vld [vmem:[%s225_s1 + $0x18] sm:$0xff] }
   0x3   :  { %8 = vsyncpa [#allocation3], 0  ;;  %v140_v7 = vpack.c.bf16 %v20_v5, %v19_v2  ;;  %v16_v8 = vld [vmem:[%s224_s0] sm:$0x3]  ;;  %vm21_vm1 = vcmask 261120   ;;  %s173_s24 = smov [#allocation2]  }
   0x4   :  { %138 = vmatpush3.bf16.msra.mxu0 %v137_v4  ;;  %v119_v9 = vld [vmem:[%s226_s2] ss:$0 sm:$0xff]  ;;  %s110_s1 = sshll.u32 %s173_s24, 4  ;;  %vm102_vm2 = vcmask 25600   ;;  %s111_s1 = int_to_ptr.vmem [resolvable:$true] %s110_s1 }
   0x5   :  { %139 = vmatprep.subr.bf16.mxu0 %v170_v3  ;;  %s146_s25 = scalar_lea.vmem %s111_s1, 32  ;;  %p151_p1 = scmp.lt.s32.totalorder %s111_s1, %s111_s1 }
   0x6   :  { %p147_p0 = scmp.ne.s32.totalorder %s111_s1, %s146_s25  ;;  %p152_p2 = scmp.lt.s32.totalorder %s146_s25, %s146_s25 }
   0x8   :  { %141 = vmatpush3.bf16.msra.mxu0 %v140_v7  ;;  %p153_p3 = por %p152_p2, %p151_p1 }
   0xa   :  { %p154_p4 = pnand %p153_p3, %p147_p0 }
   0xb   :  { %134 = vmatmul.mubr.msk.f32.vlgmr.msra.gmra.mrb[0].mxu0 %vm21_vm1, %v16_v8 }
  0xde   :  { %v91_v10 = vpop.f32.mrb[0].mxu0 }
  0xdf   :  { %v101_v11 = vadd.f32 %v119_v9, %v91_v10  ;;  %v135_v12 = vpop.f32.mrb[1].mxu0 }
  0xe1   :  { %103 = vst.msk [vmem:[#allocation2] sm:$0x3] %vm102_vm2, %v101_v11 }
  0xe2   :  { %157 = shalt.err (!%p154_p4)
}
  0xe3   :  { %s158_s27 = scalar_lea.hbm %s227_s3, 32 }
  0xe4   :  { %p159_p5 = scmp.ne.s32.totalorder %s227_s3, %s158_s27  ;;  %p162_p6 = scmp.lt.u32.totalorder %s158_s27, %s227_s3 }
  0xe6   :  { %p164_p7 = pnand %p162_p6, %p159_p5 }
  0xe8   :  { %167 = shalt.err (!%p164_p7)
}
  0xe9   :  { %113 = dma.vmem_to_hbm [thread:$0]  %s111_s1, 32, %s227_s3, [#allocation3]  }
  0xea   :  { %168 = dma.done.wait [#allocation3], 32  }
  0xeb   :  { %169 = vsyncadd [#allocation3], 4294967264 }
  0xec   :  { %117 = vsyncpa [#allocation3], 1 }

</bundles_post_ra>
